<compile_context>
chip_gen: v5e
topology: v5e:2x2
jax: 0.10.0
libtpu: 0.0.40
codegen_flags: <defaults>
</compile_context>

<pallas_src>
import numpy as np
import jax
import jax.numpy as jnp
from jax.experimental import pallas as pl
from jax.experimental.pallas import tpu as pltpu


# Module constants (from Preprocess.__init__) — deterministic, no checkpoint.
_MEAN = np.array([0.4815, 0.4578, 0.4082], dtype=np.float64)
_STD = np.array([0.2686, 0.2613, 0.2758], dtype=np.float64)


def _choose_band(Ho, Hin, Win, Wo, C, *, budget_bytes=24 << 20):
    """Pick an output row-band height TH (divides Ho) such that:
       * the matching input band height BH_in = TH*Hin//Ho is exact,
       * both TH and BH_in are sublane-friendly (multiples of 8),
       * the double-buffered band working set fits a conservative VMEM budget.
    Falls back to TH = Ho (single band per image) when nothing qualifies."""
    def working_set(th):
        bh = th * Hin // Ho
        return 2 * C * bh * Win * 2 + 2 * C * th * Wo * 4  # bf16 in + f32 out, 2x-buffered

    valid = []
    for th in range(8, Ho, 8):
        if Ho % th or (th * Hin) % Ho:
            continue
        if (th * Hin // Ho) % 8:
            continue
        if working_set(th) <= budget_bytes:
            valid.append(th)
    if not valid:
        return Ho
    deep = [th for th in valid if Ho // th >= 4]   # prefer >=4 pipeline steps per image
    return max(deep) if deep else max(valid)


def _make_kernel(C, TH, BH_in, Win, Wo, Hin, Ho, scale, bias):
    """Kernel factory. All closure values are Python ints/floats (no array consts)."""
    scale = tuple(float(s) for s in scale)
    bias = tuple(float(b) for b in bias)

    def kernel(x_ref, o_ref):
        # x_ref: (1, C, BH_in, Win) bf16 input row band (one batch element)
        # o_ref: (1, C, TH,   Wo ) f32  output row band
        #
        # One-hot row-selection matrix for this band, built from iota.
        # Local row i (0..TH) selects local source row (i*Hin)//Ho, expressed as
        # the exact integer double inequality  j*Ho <= i*Hin < (j+1)*Ho.
        ii = jax.lax.broadcasted_iota(jnp.int32, (TH, BH_in), 0)
        jj = jax.lax.broadcasted_iota(jnp.int32, (TH, BH_in), 1)
        t = ii * Hin
        sh = jnp.where((jj * Ho <= t) & (t < jj * Ho + Ho), 1.0, 0.0)
        sh = sh.astype(jnp.bfloat16)                                   # (TH, BH_in)

        # One-hot column-selection matrix: sw[w, j] = 1 iff w == (j*Win)//Wo.
        ww = jax.lax.broadcasted_iota(jnp.int32, (Win, Wo), 0)
        kk = jax.lax.broadcasted_iota(jnp.int32, (Win, Wo), 1)
        u = kk * Win
        sw = jnp.where((ww * Wo <= u) & (u < ww * Wo + Wo), 1.0, 0.0)
        sw = sw.astype(jnp.bfloat16)                                   # (Win, Wo)

        x = x_ref[0]                                                   # (C, BH_in, Win) bf16

        # Row-select: one C-batched matmul on the MXU (exact: 0/1 x integer<=255).
        sh_b = jnp.broadcast_to(sh[None], (C, TH, BH_in))
        rows = jnp.einsum('cti,ciw->ctw', sh_b, x,
                          preferred_element_type=jnp.float32)          # (C, TH, Win) f32

        # Column-select: fold channels into M and issue ONE matmul (M = C*TH).
        rows2 = rows.reshape(C * TH, Win).astype(jnp.bfloat16)         # exact (integers)
        y = jnp.dot(rows2, sw, preferred_element_type=jnp.float32)     # (C*TH, Wo)
        y = y.reshape(C, TH, Wo)

        # Fused normalize: (y/255 - mean)/std == y*scale[c] + bias[c] (f32 VPU).
        # Per-channel maps built from an iota + scalar selects (no vector consts).
        cc = jax.lax.broadcasted_iota(jnp.int32, (C, TH, Wo), 0)
        sc = jnp.full((C, TH, Wo), scale[C - 1], dtype=jnp.float32)
        bc = jnp.full((C, TH, Wo), bias[C - 1], dtype=jnp.float32)
        for c in range(C - 1):
            sc = jnp.where(cc == c, jnp.float32(scale[c]), sc)
            bc = jnp.where(cc == c, jnp.float32(bias[c]), bc)

        o_ref[0] = y * sc + bc                                         # single store

    return kernel


def preprocess(x, input_shape, mean=_MEAN, std=_STD):
    """x: (N, C, Hin, Win) pixels in [0, 255] (integer-valued). input_shape: (N, C, Ho, Wo)."""
    N, C, Hin, Win = (int(d) for d in x.shape)
    Ho, Wo = int(input_shape[2]), int(input_shape[3])

    mean = np.asarray(mean, dtype=np.float64).reshape(-1)
    std = np.asarray(std, dtype=np.float64).reshape(-1)
    assert mean.shape[0] == C and std.shape[0] == C
    scale = (1.0 / (255.0 * std)).astype(np.float32)   # per-channel multiplier
    bias = (-mean / std).astype(np.float32)            # per-channel offset

    # Row-band tiling (pipeline depth + VMEM cap); BH_in is exact by construction.
    TH = _choose_band(Ho, Hin, Win, Wo, C)
    BH_in = TH * Hin // Ho
    n_bands = Ho // TH

    kernel = _make_kernel(C, TH, BH_in, Win, Wo, Hin, Ho, scale, bias)

    out = pl.pallas_call(
        kernel,
        out_shape=jax.ShapeDtypeStruct((N, C, Ho, Wo), jnp.float32),
        grid_spec=pltpu.PrefetchScalarGridSpec(
            num_scalar_prefetch=0,
            grid=(N, n_bands),
            in_specs=[
                pl.BlockSpec((1, C, BH_in, Win), lambda n, h: (n, 0, h, 0)),
            ],
            out_specs=pl.BlockSpec((1, C, TH, Wo), lambda n, h: (n, 0, h, 0)),
        ),
        compiler_params=pltpu.CompilerParams(
            dimension_semantics=("parallel", "parallel")),
    )(x.astype(jnp.bfloat16))   # integer pixels <= 255 are exact in bf16
    return out


def _reference(x, input_shape, mean=_MEAN, std=_STD):
    N, C, Hin, Win = x.shape
    Ho, Wo = int(input_shape[2]), int(input_shape[3])
    row_idx = np.minimum((np.arange(Ho) * Hin) // Ho, Hin - 1)
    col_idx = np.minimum((np.arange(Wo) * Win) // Wo, Win - 1)
    x_np = np.asarray(x, dtype=np.float32)
    x_rs = x_np[:, :, row_idx, :][:, :, :, col_idx]
    m = np.asarray(mean, dtype=np.float32).reshape(1, -1, 1, 1)
    s = np.asarray(std, dtype=np.float32).reshape(1, -1, 1, 1)
    return ((x_rs / 255.0) - m) / s


if __name__ == "__main__":
    key = jax.random.PRNGKey(0)

    # Target shape the module resizes to (input_shape given at construction).
    # NOTE: tiny demo shape (Wo=16) leaves store lanes masked; realistic sizes
    # (Wo >= 128) are lane-dense — tune/benchmark only on those.
    input_shape = (2, 3, 16, 16)

    # Example image batch: N=2, C=3 (RGB), 20x20 spatial, integer-valued pixels
    # in [0, 255] (realistic decoded image data), stored as float32 like the
    # module expects.
    x = jnp.round(
        jax.random.uniform(key, (2, 3, 20, 20), dtype=jnp.float32,
                           minval=0.0, maxval=255.0)
    )

    out = preprocess(x, input_shape)
    out = jax.block_until_ready(out)

    ref = _reference(x, input_shape)
    assert out.shape == (2, 3, 16, 16)
    np.testing.assert_allclose(np.asarray(out), ref, rtol=1e-5, atol=1e-5)

    print("KERNEL_OK")
</pallas_src>

<mosaic_0001>
module attributes {stable_mosaic.version = 11 : i64} {
  func.func @kernel(%arg0: i32, %arg1: i32, %arg2: memref<1x3x20x20xbf16, #tpu.memory_space<vmem>>, %arg3: memref<1x3x16x16xf32, #tpu.memory_space<vmem>>) attributes {dimension_semantics = [#tpu.dimension_semantics<parallel>, #tpu.dimension_semantics<parallel>], iteration_bounds = array<i64: 2, 1>, scalar_prefetch = 0 : i64, scratch_operands = 0 : i64, tpu.core_type = #tpu.core_type<tc>, window_params = [{transform_indices = @transform_0, window_bounds = array<i64: 1, 3, 20, 20>}, {transform_indices = @transform_1, window_bounds = array<i64: 1, 3, 16, 16>}]} {
    %0 = tpu.iota {dimensions = array<i32: 0>} : vector<16x20xi32>
    %1 = tpu.iota {dimensions = array<i32: 1>} : vector<16x20xi32>
    %c20_i32 = arith.constant 20 : i32
    %2 = vector.broadcast %c20_i32 : i32 to vector<16x20xi32>
    %3 = arith.muli %0, %2 : vector<16x20xi32>
    %c16_i32 = arith.constant 16 : i32
    %4 = vector.broadcast %c16_i32 : i32 to vector<16x20xi32>
    %5 = arith.muli %1, %4 : vector<16x20xi32>
    %6 = arith.cmpi sle, %5, %3 : vector<16x20xi32>
    %c16_i32_0 = arith.constant 16 : i32
    %7 = vector.broadcast %c16_i32_0 : i32 to vector<16x20xi32>
    %8 = arith.muli %1, %7 : vector<16x20xi32>
    %c16_i32_1 = arith.constant 16 : i32
    %9 = vector.broadcast %c16_i32_1 : i32 to vector<16x20xi32>
    %10 = arith.addi %8, %9 : vector<16x20xi32>
    %11 = arith.cmpi slt, %3, %10 : vector<16x20xi32>
    %12 = arith.andi %6, %11 : vector<16x20xi1>
    %cst = arith.constant 1.000000e+00 : f32
    %cst_2 = arith.constant 0.000000e+00 : f32
    %13 = vector.broadcast %cst : f32 to vector<16x20xf32>
    %14 = vector.broadcast %cst_2 : f32 to vector<16x20xf32>
    %15 = arith.select %12, %13, %14 : vector<16x20xi1>, vector<16x20xf32>
    %16 = arith.truncf %15 : vector<16x20xf32> to vector<16x20xbf16>
    %17 = tpu.iota {dimensions = array<i32: 0>} : vector<20x16xi32>
    %18 = tpu.iota {dimensions = array<i32: 1>} : vector<20x16xi32>
    %c20_i32_3 = arith.constant 20 : i32
    %19 = vector.broadcast %c20_i32_3 : i32 to vector<20x16xi32>
    %20 = arith.muli %18, %19 : vector<20x16xi32>
    %c16_i32_4 = arith.constant 16 : i32
    %21 = vector.broadcast %c16_i32_4 : i32 to vector<20x16xi32>
    %22 = arith.muli %17, %21 : vector<20x16xi32>
    %23 = arith.cmpi sle, %22, %20 : vector<20x16xi32>
    %c16_i32_5 = arith.constant 16 : i32
    %24 = vector.broadcast %c16_i32_5 : i32 to vector<20x16xi32>
    %25 = arith.muli %17, %24 : vector<20x16xi32>
    %c16_i32_6 = arith.constant 16 : i32
    %26 = vector.broadcast %c16_i32_6 : i32 to vector<20x16xi32>
    %27 = arith.addi %25, %26 : vector<20x16xi32>
    %28 = arith.cmpi slt, %20, %27 : vector<20x16xi32>
    %29 = arith.andi %23, %28 : vector<20x16xi1>
    %cst_7 = arith.constant 1.000000e+00 : f32
    %cst_8 = arith.constant 0.000000e+00 : f32
    %30 = vector.broadcast %cst_7 : f32 to vector<20x16xf32>
    %31 = vector.broadcast %cst_8 : f32 to vector<20x16xf32>
    %32 = arith.select %29, %30, %31 : vector<20x16xi1>, vector<20x16xf32>
    %33 = arith.truncf %32 : vector<20x16xf32> to vector<20x16xbf16>
    %c0 = arith.constant 0 : index
    %c0_9 = arith.constant 0 : index
    %c0_10 = arith.constant 0 : index
    %c0_11 = arith.constant 0 : index
    %34 = vector.load %arg2[%c0, %c0_9, %c0_10, %c0_11] : memref<1x3x20x20xbf16, #tpu.memory_space<vmem>>, vector<1x3x20x20xbf16>
    %35 = vector.shape_cast %34 : vector<1x3x20x20xbf16> to vector<3x20x20xbf16>
    %36 = vector.shape_cast %16 : vector<16x20xbf16> to vector<1x16x20xbf16>
    %37 = vector.shape_cast %36 : vector<1x16x20xbf16> to vector<1x16x20xbf16>
    %38 = vector.broadcast %37 : vector<1x16x20xbf16> to vector<3x16x20xbf16>
    "tpu.trace_start"() <{level = 10 : i32, message = "cti,ciw->ctw"}> : () -> ()
    %cst_12 = arith.constant dense<0.000000e+00> : vector<3x16x20xf32>
    %39 = tpu.matmul %38, %35, %cst_12 {dimension_numbers = #tpu.dot_dimension_numbers<[2], [1], [1], [2], [0, 0, 0, 1, 1, 2], [0], [0]>} : vector<3x16x20xbf16>, vector<3x20x20xbf16>, vector<3x16x20xf32> -> vector<3x16x20xf32>
    "tpu.trace_stop"() : () -> ()
    %40 = vector.shape_cast %39 : vector<3x16x20xf32> to vector<48x20xf32>
    %41 = arith.truncf %40 : vector<48x20xf32> to vector<48x20xbf16>
    %cst_13 = arith.constant dense<0.000000e+00> : vector<48x16xf32>
    %42 = tpu.matmul %41, %33, %cst_13 {dimension_numbers = #tpu.dot_dimension_numbers<[1], [0], [0], [1], [0, 0, 1, 1], [], []>} : vector<48x20xbf16>, vector<20x16xbf16>, vector<48x16xf32> -> vector<48x16xf32>
    %43 = vector.shape_cast %42 : vector<48x16xf32> to vector<3x16x16xf32>
    %44 = tpu.iota {dimensions = array<i32: 0>} : vector<3x16x16xi32>
    %cst_14 = arith.constant 0.0142188855 : f32
    %45 = vector.broadcast %cst_14 : f32 to vector<3x16x16xf32>
    %cst_15 = arith.constant -1.48005795 : f32
    %46 = vector.broadcast %cst_15 : f32 to vector<3x16x16xf32>
    %c0_i32 = arith.constant 0 : i32
    %47 = vector.broadcast %c0_i32 : i32 to vector<3x16x16xi32>
    %48 = arith.cmpi eq, %44, %47 : vector<3x16x16xi32>
    %cst_16 = arith.constant 0.014600032 : f32
    %49 = vector.broadcast %cst_16 : f32 to vector<3x16x16xf32>
    %50 = arith.select %48, %49, %45 : vector<3x16x16xi1>, vector<3x16x16xf32>
    %c0_i32_17 = arith.constant 0 : i32
    %51 = vector.broadcast %c0_i32_17 : i32 to vector<3x16x16xi32>
    %52 = arith.cmpi eq, %44, %51 : vector<3x16x16xi32>
    %cst_18 = arith.constant -1.79262841 : f32
    %53 = vector.broadcast %cst_18 : f32 to vector<3x16x16xf32>
    %54 = arith.select %52, %53, %46 : vector<3x16x16xi1>, vector<3x16x16xf32>
    %c1_i32 = arith.constant 1 : i32
    %55 = vector.broadcast %c1_i32 : i32 to vector<3x16x16xi32>
    %56 = arith.cmpi eq, %44, %55 : vector<3x16x16xi32>
    %cst_19 = arith.constant 0.0150079168 : f32
    %57 = vector.broadcast %cst_19 : f32 to vector<3x16x16xf32>
    %58 = arith.select %56, %57, %50 : vector<3x16x16xi1>, vector<3x16x16xf32>
    %c1_i32_20 = arith.constant 1 : i32
    %59 = vector.broadcast %c1_i32_20 : i32 to vector<3x16x16xi32>
    %60 = arith.cmpi eq, %44, %59 : vector<3x16x16xi32>
    %cst_21 = arith.constant -1.75200915 : f32
    %61 = vector.broadcast %cst_21 : f32 to vector<3x16x16xf32>
    %62 = arith.select %60, %61, %54 : vector<3x16x16xi1>, vector<3x16x16xf32>
    %63 = arith.mulf %43, %58 : vector<3x16x16xf32>
    %64 = arith.addf %63, %62 : vector<3x16x16xf32>
    %c0_22 = arith.constant 0 : index
    %c0_23 = arith.constant 0 : index
    %c0_24 = arith.constant 0 : index
    %c0_25 = arith.constant 0 : index
    %65 = vector.load %arg3[%c0_22, %c0_23, %c0_24, %c0_25] : memref<1x3x16x16xf32, #tpu.memory_space<vmem>>, vector<1x3x16x16xf32>
    %66 = vector.shape_cast %65 : vector<1x3x16x16xf32> to vector<3x16x16xf32>
    %67 = vector.shape_cast %64 : vector<3x16x16xf32> to vector<1x3x16x16xf32>
    tpu.vector_store %arg3[%c0_22, %c0_23, %c0_24, %c0_25], %67 {strides = array<i32>} : memref<1x3x16x16xf32, #tpu.memory_space<vmem>>, vector<1x3x16x16xf32>,
    return
  }
  func.func @transform_0(%arg0: i32, %arg1: i32) -> (i32, i32, i32, i32) {
    %c0_i32 = arith.constant 0 : i32
    %c0_i32_0 = arith.constant 0 : i32
    %c0_i32_1 = arith.constant 0 : i32
    return %arg0, %c0_i32, %arg1, %c0_i32_0 : i32, i32, i32, i32
  }
  func.func @transform_1(%arg0: i32, %arg1: i32) -> (i32, i32, i32, i32) {
    %c0_i32 = arith.constant 0 : i32
    %c0_i32_0 = arith.constant 0 : i32
    %c0_i32_1 = arith.constant 0 : i32
    return %arg0, %c0_i32, %arg1, %c0_i32_0 : i32, i32, i32, i32
  }
}

</mosaic_0001>

<bundles_post_ra>
// kernel: tpu_custom_call.1
= control target key start
LH: loop header
LB: loop body
LE: loop exit
PB: predicated region body
PF: predicated region fallthrough
CT: control target
= control target key end

     0   :  { %6 = vsyncpa [#allocation3], 0  ;;  %s771_s0 = inlined_call_operand.vmem [shape: bf16[2,3,20,20], index: 0, kind: input, shape index: {}]   ;;  %s772_s1 = inlined_call_operand.hbm [shape: f32[2,3,16,16], index: 1, kind: output, shape index: {}]  }
   0x1   :  { %8 = vsyncpa [#allocation3 + $0x1], 0  ;;  %s630_s6 = smov 0   ;;  %s632_s7 = smov 0  }
   0x2   :  { %s634_s8 = smov 0   ;;  %s636_s9 = smov 0  }
   0x3   :  { %s638_s10 = smov 0   ;;  %s640_s11 = smov 0  }
   0x4 LB: > { %s440_s12 = sadd.s32 4294967295, %s614_s11   ;;  %s441_s13 = sadd.s32 4294967294, %s614_s11   ;;  %s614_s11 = sphi %s640_s11, %s14_s11   ;;  %s610_s10 = sphi %s638_s10, %s781_s10   ;;  %s606_s9 = sphi %s636_s9, %s780_s9   ;;  %s602_s8 = sphi %s634_s8, %s779_s8   ;;  %s598_s7 = sphi %s632_s7, %s778_s7   ;;  %s594_s6 = sphi %s630_s6, %s777_s6  }
   0x5   : > { %s26_s14 = sadd.s32 1, %s610_s10  ;;  %s63_s15 = sadd.s32 1, %s602_s8 }
   0x6   : > { %p28_p0 = scmp.ge.s32.totalorder %s26_s14, 2  ;;  %p73_p1 = scmp.ne.s32.totalorder %s602_s8, %s598_s7 }
   0x7   : > { %p74_p2 = scmp.eq.s32.totalorder %s440_s12, 1  ;;  %p79_p3 = scmp.ne.s32.totalorder %s598_s7, %s594_s6 }
   0x8   : > { %s783_s14 = smov (%p28_p0, %s26_s14), 0  ;;  %p80_p5 = scmp.eq.s32.totalorder %s441_s13, 1 }
   0x9   : > { %p670_p4 = por %p74_p2, %p73_p1  ;;  %s58_s17 = ssub.s32 %s610_s10, %s783_s14 }
   0xa   : > { %p444_p6 = scmp.ge.s32.totalorder %s614_s11, 1  ;;  %p61_p7 = scmp.eq.s32.totalorder %s58_s17, 0 }
   0xb   : > { %p677_p8 = por %p80_p5, %p79_p3  ;;  %p111_p9 = scmp.lt.s32.totalorder %s614_s11, 3 }
   0xc   : > { %s683_s19 = scalar_select %p61_p7, %s602_s8, %s63_s15  }
   0xd   : > { %p112_p10 = pnand %p444_p6, %p111_p9 }
   0xe   : > { %p136_p11 = scmp.lt.s32.totalorder (!%p112_p10), %s606_s9, 1  ;;  %s132_s25 = sand.u32 (!%p112_p10), 1, %s598_s7  }
   0xf   : > { %115 = sbr.rel (%p112_p10) target bundleno = 338 (0x152), region = 24  ;;  %s344_s5 = scalar_lea.sflag (!%p112_p10), [#allocation3], %s132_s25 }
  0x10   : > { %s474_s26 = smul.u32 (!%p112_p10), 48, %s132_s25  ;;  %s556_s17 = scalar_lea.hbm (!%p112_p10), %s772_s1, 96 }
  0x11   : > { %s476_s28 = smul.u32 (!%p112_p10), 48, %s606_s9 }
  0x12   : > { %s134_s27 = scalar_lea.vmem (!%p112_p10), [#allocation2], %s474_s26 }
  0x13   : > { %s357_s2 = scalar_lea.hbm (!%p112_p10), %s772_s1, %s476_s28  ;;  %s358_s3 = sshll.u32 (!%p112_p10), %s134_s27, 4  ;;  %s359_s3 = int_to_ptr.vmem [resolvable:$true] %s358_s3 }
  0x14   : > { %v147_v0 = vlaneseq  ;;  %s137_s20 = scalar_select %p136_p11, %s606_s9, 1  ;;  %vm215_vm3 = vcmask 1041408   ;;  %v616_v17 = vmov 0.0   ;;  %vm211_vm7 = vcmask 162816  }
  0x15   : > { %v617_v43 = vmov 1.0|1.0   ;;  %s360_s4 = sshll.u32 %s357_s2, 4  ;;  %s361_s4 = int_to_ptr.hbm [resolvable:$true] %s360_s4 }
  0x16   : > { %v687_v1 = vshrl.u32 %v147_v0, 7  ;;  %v151_v2 = vand.u32 127, %v147_v0  ;;  %s475_s21 = smul.u32 36, %s137_s20  ;;  %s550_s9 = sshra.s32 %s361_s4, 4  ;;  %s551_s9 = int_to_ptr.hbm [resolvable:$true] %s550_s9 }
  0x17   : > { %s552_s12 = scalar_lea.hbm %s551_s9, 48  ;;  %p557_p1 = scmp.lt.s32.totalorder %s551_s9, %s772_s1 }
  0x18   : > { %v690_v3 = vadd.s32 8, %v687_v1  ;;  %v152_v4 = vmul.u32 20, %v687_v1  ;;  %v154_v5 = vmul.u32 16, %v151_v2  ;;  %s696_s24 = scalar_lea.vmem %s771_s0, %s475_s21  ;;  %v166_v32 = vadd.s32 16, %v687_v1  ;;  %p553_p12 = scmp.ne.s32.totalorder %s551_s9, %s552_s12 }
  0x19   : > { %v193_v9 = vld [vmem:[%s696_s24 + $0x14] sm:$0x3]  ;;  %v196_v10 = vld [vmem:[%s696_s24 + $0x20] sm:$0x3]  ;;  %v190_v13 = vld [vmem:[%s696_s24 + $0x8] sm:$0x3]  ;;  %p558_p2 = scmp.lt.s32.totalorder %s556_s17, %s552_s12 }
  0x1a   : > { %v153_v6 = vmul.u32 20, %v690_v3  ;;  %vm699_vm0 = vcmp.le.s32.totalorder %v154_v5, %v152_v4  ;;  %v157_v8 = vadd.s32 16, %v154_v5  ;;  %v238_v11 = vunpack.c.l.b16 %v193_v9  ;;  %v470_v25 = vld [vmem:[%s696_s24 + $0xc] sm:$0xff]  ;;  %v471_v27 = vld [vmem:[%s696_s24 + $0x18] sm:$0xff]  ;;  %v469_v30 = vld [vmem:[%s696_s24] sm:$0xff]  ;;  %p554_p13 = pnand %p553_p12, %p670_p4 }
  0x1b   : > { %v264_v12 = vunpack.c.l.b16 %v196_v10  ;;  %v207_v14 = vunpack.c.l.b16 %v190_v13  ;;  %v167_v33 = vmul.u32 20, %v151_v2  ;;  %v170_v34 = vmul.u32 16, %v166_v32  ;;  %p559_p3 = por %p558_p2, %p557_p1 }
  0x1c   : > { %vm156_vm1 = vcmp.le.s32.totalorder %v154_v5, %v153_v6  ;;  %vm158_vm2 = vcmp.lt.s32.totalorder %v152_v4, %v157_v8  ;;  %vm159_vm4 = vcmp.lt.s32.totalorder %v153_v6, %v157_v8  ;;  %v240_v15 = vpack.c.b16 %v238_v11, %v238_v11  ;;  %p555_p0 = pneg %p554_p13 }
  0x1d   : > { %vm160_vm5 = vmand %vm699_vm0, %vm158_vm2  ;;  %v266_v16 = vpack.c.b16 %v264_v12, %v264_v12  ;;  %v209_v19 = vpack.c.b16 %v207_v14, %v207_v14  ;;  %v176_v35 = vadd.s32 16, %v170_v34  ;;  %vm173_vm8 = vcmp.le.s32.totalorder %v170_v34, %v167_v33 }
  0x1e   : > { %vm161_vm6 = vmand %vm156_vm1, %vm159_vm4  ;;  %v162_v18 = vsel %vm160_vm5, 1.0, %v616_v17  ;;  %v243_v22 = vsel %vm215_vm3, %v240_v15, 0  ;;  %v168_v38 = vmul.u32 16, %v687_v1  ;;  %v169_v39 = vmul.u32 16, %v690_v3  ;;  %p560_p5 = pnand %p559_p3, %p555_p0 }
  0x1f   : > { %v163_v20 = vsel %vm161_vm6, 1.0, %v616_v17  ;;  %v164_v21 = vpack.c.bf16 %v162_v18, %v162_v18  ;;  %v269_v23 = vsel %vm215_vm3, %v266_v16, 0  ;;  %251 = vmatpush.bf16.msra.mxu1 %v243_v22  ;;  %v217_v26 = vsel %vm215_vm3, %v209_v19, 0 }
  0x20   : > { %v165_v24 = vpack.c.bf16 %v163_v20, %v163_v20  ;;  %277 = vmatpush.bf16.msra.mxu2 %v269_v23  ;;  %225 = vmatpush.bf16.msra.mxu0 %v217_v26  ;;  %vm179_vm9 = vcmp.lt.s32.totalorder %v167_v33, %v176_v35  ;;  %v174_v41 = vadd.s32 16, %v168_v38  ;;  %v175_v42 = vadd.s32 16, %v169_v39 }
  0x21   : > { %v199_v28 = vunpack.c.l.b16 %v164_v21  ;;  %vm182_vm10 = vmand %vm173_vm8, %vm179_vm9  ;;  %vm171_vm11 = vcmp.le.s32.totalorder %v168_v38, %v167_v33  ;;  %vm172_vm12 = vcmp.le.s32.totalorder %v169_v39, %v167_v33  ;;  %vm336_vm2 = vcmask 130048  }
  0x22   : > { %v200_v29 = vunpack.c.l.b16 %v165_v24  ;;  %v185_v36 = vsel %vm182_vm10, 1.0, %v616_v17  ;;  %vm177_vm13 = vcmp.lt.s32.totalorder %v167_v33, %v174_v41  ;;  %vm178_vm14 = vcmp.lt.s32.totalorder %v167_v33, %v175_v42 }
  0x23   : > { %252 = vmatpush.bf16.msra.mxu1 %v470_v25  ;;  %v187_v37 = vpack.c.bf16 %v185_v36, %v185_v36  ;;  %vm180_vm15 = vmand %vm171_vm11, %vm177_vm13 }
  0x24   : > { %v201_v31 = vpack.c.b16 %v200_v29, %v199_v28  ;;  %278 = vmatpush.bf16.msra.mxu2 %v471_v27  ;;  %226 = vmatpush.bf16.msra.mxu0 %v469_v30  ;;  %vm181_vm0 = vmand %vm172_vm12, %vm178_vm14 }
  0x25   : > { %v298_v40 = vsel %vm215_vm3, %v187_v37, 0  ;;  %vm461_vm1 = vmpackc.low %vm181_vm0, %vm180_vm15 }
  0x26   : > { %455 = vmatmul.msk.bf16.vlgmr.msra.gmra.mxu1 %vm211_vm7, %v201_v31  ;;  %472 = vmatpush.bf16.msra.mxu3 %v298_v40 }
  0x27   : > { %460 = vmatmul.msk.bf16.vlgmr.msra.gmra.mxu2 %vm211_vm7, %v201_v31  ;;  %450 = vmatmul.msk.bf16.vlgmr.msra.gmra.mxu0 %vm211_vm7, %v201_v31 }
  0x28   : > { %306 = vmatpush.bf16.msrb.mxu0 %v298_v40 }
  0x2a   : > { %473 = vmatpush.bf16.msk.msra.mxu3 %vm461_vm1, %v617_v43 }
  0x2c   : > { %462 = vmatpush.bf16.msk.msrb.mxu0 %vm461_vm1, %v617_v43 }
  0xa3   : > { %v254_v44 = vpop.f32.mrf.mxu1 }
  0xa4   : > { %v228_v45 = vpop.f32.mrf.mxu0 }
  0xaa   : > { %v280_v50 = vpop.f32.mrf.mxu2 }
  0xab   : > { %v256_v46 = vpop.f32.mrf.mxu1 }
  0xac   : > { %v286_v47 = vpack.c.bf16 %v256_v46, %v254_v44  ;;  %v230_v48 = vpop.f32.mrf.mxu0 }
  0xad   : > { %v285_v49 = vpack.c.bf16 %v230_v48, %v228_v45 }
  0xae   : > { %464 = vmatmul.msk.bf16.vlgmr.msra.gmra.mxu3 %vm211_vm7, %v286_v47 }
  0xaf   : > { %463 = vmatmul.msk.bf16.vlgmr.msrb.gmra.mxu0 %vm211_vm7, %v285_v49 }
  0xb2   : > { %v282_v51 = vpop.f32.mrf.mxu2 }
  0xb3   : > { %v287_v52 = vpack.c.bf16 %v282_v51, %v280_v50 }
  0xbe   : > { %465 = vmatmul.msk.bf16.gmra.mxu3 %vm211_vm7, %v287_v52 }
 0x12c   : > { %v309_v53 = vpop.f32.mrf.mxu0 }
 0x12d   : > { %v324_v54 = vmul.f32 0.014600032, %v309_v53 }
 0x12f   : > { %v330_v55 = vadd.f32 -1.7926284, %v324_v54 }
 0x131   : > { %337 = vst.msk [vmem:[%s134_s27] sm:$0xff] %vm336_vm2, %v330_v55  ;;  %v314_v56 = vpop.f32.mrf.mxu3 }
 0x132   : > { %v326_v57 = vmul.f32 0.015007917, %v314_v56 }
 0x134   : > { %v332_v58 = vadd.f32 -1.7520092, %v326_v57  ;;  %v311_v59 = vpop.f32.mrf.mxu0 }
 0x135   : > { %v325_v60 = vmul.f32 0.014600032, %v311_v59 }
 0x136   : > { %339 = vst.msk [vmem:[%s134_s27 + $0x10] sm:$0xff] %vm336_vm2, %v332_v58 }
 0x137   : > { %v331_v61 = vadd.f32 -1.7926284, %v325_v60 }
 0x139   : > { %338 = vst.msk [vmem:[%s134_s27 + $0x8] sm:$0xff] %vm336_vm2, %v331_v61  ;;  %v316_v62 = vpop.f32.mrf.mxu3 }
 0x13a   : > { %v327_v63 = vmul.f32 0.015007917, %v316_v62 }
 0x13c   : > { %v333_v0 = vadd.f32 -1.7520092, %v327_v63 }
 0x13e   : > { %340 = vst.msk [vmem:[%s134_s27 + $0x18] sm:$0xff] %vm336_vm2, %v333_v0 }
 0x141   : > { %v319_v1 = vpop.f32.mrf.mxu3 }
 0x142   : > { %v328_v2 = vmul.f32 0.014218885, %v319_v1 }
 0x144   : > { %v334_v3 = vadd.f32 -1.480058, %v328_v2 }
 0x146   : > { %341 = vst.msk [vmem:[%s134_s27 + $0x20] sm:$0xff] %vm336_vm2, %v334_v3 }
 0x149   : > { %v321_v4 = vpop.f32.mrf.mxu3 }
 0x14a   : > { %v329_v5 = vmul.f32 0.014218885, %v321_v4 }
 0x14c   : > { %v335_v6 = vadd.f32 -1.480058, %v329_v5 }
 0x14e   : > { %342 = vst.msk [vmem:[%s134_s27 + $0x28] sm:$0xff] %vm336_vm2, %v335_v6 }
 0x14f   : > { %563 = shalt.err (!%p560_p5)
}
 0x150   : > { %s618_s22 = smov 128   ;;  %s619_s23 = smov 8  }
 0x151   : > { %477 = dma.vmem_to_hbm [thread:$0]  (%p670_p4), %s359_s3, 768, %s361_s4, %s344_s5, %s618_s22, %s618_s22, %s619_s23  }
 0x152 PF: > { %p483_p6 = scmp.ge.s32.totalorder %s614_s11, 2  ;;  %s375_s24 = sand.u32 1, %s594_s6  }
 0x153   : > { %s376_s25 = scalar_lea.sflag [#allocation3], %s375_s24 }
 0x154   : > { %p480_p7 = pnand %p483_p6, %p677_p8 }
 0x156   : > { %p481_p9 = pneg %p480_p7 }
 0x158   : > { %589 = dma.done.wait (%p481_p9), %s376_s25, 768  }
 0x159   : > { %591 = vsyncadd (%p481_p9), %s376_s25, 4294966528  ;;  %s14_s11 = sadd.s32 1, %s614_s11   ;;  %s777_s6 = smov %s598_s7 }
 0x15a   : > { %p11_p10 = scmp.ge.s32.totalorder %s14_s11, 4   ;;  %s778_s7 = smov %s602_s8 }
 0x15b   : > { %s779_s8 = smov %s683_s19  ;;  %s780_s9 = smov %s610_s10 }
 0x15c   : > { %s781_s10 = smov %s783_s14  ;;  %13 = sbr.rel (!%p11_p10) target bundleno = 4 (0x4), region = 59 }
 0x161   :  { %382 = vsyncpa [#allocation3], 1 }
 0x162   :  { %384 = vsyncpa [#allocation3 + $0x1], 1 }

</bundles_post_ra>
